<compile_context>
chip_gen: v6e
topology: v6e:2x2x1
jax: 0.10.0
libtpu: 0.0.40
codegen_flags: <defaults>
</compile_context>

<pallas_src>
import functools
import math

import jax
import jax.numpy as jnp
from jax import lax
from jax.experimental import pallas as pl
from jax.experimental.pallas import tpu as pltpu


# ---------------------------------------------------------------------------
# Parameter (buffer) setup -- plain JAX glue, deterministic
# ---------------------------------------------------------------------------
def make_pos_embedding(emb_size: int, maxlen: int = 5000,
                       dtype=jnp.float32) -> jnp.ndarray:
    """Reproduces the PyTorch buffer: shape (maxlen, 1, emb_size)."""
    den = jnp.exp(-jnp.arange(0, emb_size, 2, dtype=jnp.float32)
                  * math.log(10000.0) / emb_size)
    pos = jnp.arange(0, maxlen, dtype=jnp.float32).reshape(maxlen, 1)
    pe = jnp.zeros((maxlen, emb_size), dtype=jnp.float32)
    pe = pe.at[:, 0::2].set(jnp.sin(pos * den))
    pe = pe.at[:, 1::2].set(jnp.cos(pos * den))
    return pe[:, None, :].astype(dtype)          # (maxlen, 1, emb_size)


# ---------------------------------------------------------------------------
# Counter-based hash (murmur3 fmix32) -- plain u32 VPU ops, interpret-safe
# ---------------------------------------------------------------------------
def _fmix32(x):
    x = x ^ (x >> jnp.uint32(16))
    x = x * jnp.uint32(0x85EBCA6B)
    x = x ^ (x >> jnp.uint32(13))
    x = x * jnp.uint32(0xC2B2AE35)
    x = x ^ (x >> jnp.uint32(16))
    return x


# ---------------------------------------------------------------------------
# Pallas kernel: broadcast add + (optional) dropout, all elementwise on VPU
# ---------------------------------------------------------------------------
def pe_kernel(seed_ref, x_ref, pos_ref, o_ref, *, dropout_p: float):
    x = x_ref[...]                       # (TS, B, E), input dtype
    pos = pos_ref[...].astype(x.dtype)   # (TS, 1, E) -> broadcasts over B
    y = x + pos

    if dropout_p > 0.0:
        ts, b, e = y.shape
        # Global element index -> unique counter per element across all tiles.
        s_idx = lax.broadcasted_iota(jnp.int32, (ts, b, e), 0) \
            + pl.program_id(0) * ts
        b_idx = lax.broadcasted_iota(jnp.int32, (ts, b, e), 1)
        e_idx = lax.broadcasted_iota(jnp.int32, (ts, b, e), 2)
        lin = (s_idx * b + b_idx) * e + e_idx

        seed_u = seed_ref[0].astype(jnp.uint32)
        bits = _fmix32(lin.astype(jnp.uint32) + seed_u * jnp.uint32(0x9E3779B9))

        # Pure integer threshold compare: P(keep) = 1 - dropout_p
        threshold = jnp.uint32(min(int(round(dropout_p * 2.0 ** 32)),
                                   0xFFFFFFFF))
        keep = bits >= threshold
        scale = jnp.asarray(1.0 / (1.0 - dropout_p), dtype=y.dtype)
        y = jnp.where(keep, y * scale, jnp.zeros_like(y))

    o_ref[...] = y.astype(o_ref.dtype)


# ---------------------------------------------------------------------------
# Wrapper
# ---------------------------------------------------------------------------
def _pick_tile_s(S: int, B: int, E: int, itemsize: int,
                 target_bytes: int = 2 << 20) -> int:
    """Rows of S per tile so each x/out tile is ~1-4 MiB (VMEM-safe on v7x)."""
    rows = max(1, target_bytes // max(1, B * E * itemsize))
    rows = min(S, rows)
    if rows >= 8:
        rows = (rows // 8) * 8      # DMA-friendly granularity
    return rows


def positional_encoding_forward(x: jnp.ndarray,
                                pos_embedding: jnp.ndarray,
                                dropout_p: float = 0.0,
                                seed: int = 0) -> jnp.ndarray:
    """x: (S, B, E); pos_embedding: (maxlen, 1, E)."""
    S, B, E = x.shape
    pos = pos_embedding[:S].astype(x.dtype)       # (S, 1, E), cast once
    seed_arr = jnp.array([seed], dtype=jnp.int32)

    TS = _pick_tile_s(S, B, E, jnp.dtype(x.dtype).itemsize)
    grid = (pl.cdiv(S, TS),)

    kernel = functools.partial(pe_kernel, dropout_p=float(dropout_p))

    # NOTE: for best packing, B should be >= 8 (sublanes) and E a multiple of
    # 128 (lanes); typical transformer shapes (E >= 128) satisfy the latter.
    return pl.pallas_call(
        kernel,
        out_shape=jax.ShapeDtypeStruct((S, B, E), x.dtype),
        grid_spec=pltpu.PrefetchScalarGridSpec(
            num_scalar_prefetch=1,                # seed lands in SMEM
            grid=grid,
            in_specs=[
                pl.BlockSpec((TS, B, E), lambda i, seed: (i, 0, 0)),
                pl.BlockSpec((TS, 1, E), lambda i, seed: (i, 0, 0)),
            ],
            out_specs=pl.BlockSpec((TS, B, E), lambda i, seed: (i, 0, 0)),
        ),
        compiler_params=pltpu.CompilerParams(
            dimension_semantics=("parallel",),
            vmem_limit_bytes=32 * 1024 * 1024,
        ),
    )(seed_arr, x, pos)


# ---------------------------------------------------------------------------
# Demo / self-check
# ---------------------------------------------------------------------------
if __name__ == "__main__":
    S, B, E = 8, 2, 32          # small seq=8, batch=2, emb_size=32
    MAXLEN = 64
    DROPOUT = 0.1

    key = jax.random.PRNGKey(0)
    x = jax.random.normal(key, (S, B, E), dtype=jnp.float32)

    pos_embedding = make_pos_embedding(E, maxlen=MAXLEN)
    ref = x + pos_embedding[:S]

    # 1) deterministic path (dropout disabled) -- check against pure-JAX ref
    out_eval = positional_encoding_forward(x, pos_embedding, dropout_p=0.0)
    out_eval = jax.block_until_ready(out_eval)
    assert out_eval.shape == (S, B, E)
    assert jnp.allclose(out_eval, ref, atol=1e-6, rtol=1e-6), "mismatch vs ref"

    # 2) training path with dropout (mask generated in-kernel via integer hash)
    out_train = positional_encoding_forward(
        x, pos_embedding, dropout_p=DROPOUT, seed=1234)
    out_train = jax.block_until_ready(out_train)
    assert out_train.shape == (S, B, E)
    # every element must equal either 0 (dropped) or ref * 1/(1-p) (kept)
    scaled_ref = ref * jnp.float32(1.0 / (1.0 - DROPOUT))
    expected = jnp.where(out_train == 0, jnp.zeros_like(scaled_ref), scaled_ref)
    assert jnp.allclose(out_train, expected, atol=1e-5, rtol=1e-5), \
        "dropout path mismatch"

    print("KERNEL_OK")
</pallas_src>

<mosaic_0001>
module attributes {stable_mosaic.version = 11 : i64} {
  func.func @pe_kernel(%arg0: i32, %arg1: memref<1xi32, #tpu.memory_space<smem>>, %arg2: memref<8x2x32xf32, #tpu.memory_space<vmem>>, %arg3: memref<8x1x32xf32, #tpu.memory_space<vmem>>, %arg4: memref<8x2x32xf32, #tpu.memory_space<vmem>>) attributes {dimension_semantics = [#tpu.dimension_semantics<parallel>], iteration_bounds = array<i64: 1>, scalar_prefetch = 1 : i64, scratch_operands = 0 : i64, tpu.core_type = #tpu.core_type<tc>, window_params = [{transform_indices = @transform_0, window_bounds = array<i64: 8, 2, 32>}, {transform_indices = @transform_1, window_bounds = array<i64: 8, 1, 32>}, {transform_indices = @transform_2, window_bounds = array<i64: 8, 2, 32>}]} {
    %c0 = arith.constant 0 : index
    %c0_0 = arith.constant 0 : index
    %c0_1 = arith.constant 0 : index
    %0 = vector.load %arg2[%c0, %c0_0, %c0_1] : memref<8x2x32xf32, #tpu.memory_space<vmem>>, vector<8x2x32xf32>
    %c0_2 = arith.constant 0 : index
    %c0_3 = arith.constant 0 : index
    %c0_4 = arith.constant 0 : index
    %1 = vector.load %arg3[%c0_2, %c0_3, %c0_4] : memref<8x1x32xf32, #tpu.memory_space<vmem>>, vector<8x1x32xf32>
    %2 = vector.broadcast %1 : vector<8x1x32xf32> to vector<8x2x32xf32>
    %3 = arith.addf %0, %2 : vector<8x2x32xf32>
    %c0_5 = arith.constant 0 : index
    %c0_6 = arith.constant 0 : index
    %c0_7 = arith.constant 0 : index
    %4 = vector.load %arg4[%c0_5, %c0_6, %c0_7] : memref<8x2x32xf32, #tpu.memory_space<vmem>>, vector<8x2x32xf32>
    tpu.vector_store %arg4[%c0_5, %c0_6, %c0_7], %3 {strides = array<i32>} : memref<8x2x32xf32, #tpu.memory_space<vmem>>, vector<8x2x32xf32>,
    return
  }
  func.func @transform_0(%arg0: i32, %arg1: memref<1xi32, #tpu.memory_space<smem>>) -> (i32, i32, i32) {
    %c0_i32 = arith.constant 0 : i32
    %c0_i32_0 = arith.constant 0 : i32
    %c0_i32_1 = arith.constant 0 : i32
    return %arg0, %c0_i32, %c0_i32_0 : i32, i32, i32
  }
  func.func @transform_1(%arg0: i32, %arg1: memref<1xi32, #tpu.memory_space<smem>>) -> (i32, i32, i32) {
    %c0_i32 = arith.constant 0 : i32
    %c0_i32_0 = arith.constant 0 : i32
    %c0_i32_1 = arith.constant 0 : i32
    return %arg0, %c0_i32, %c0_i32_0 : i32, i32, i32
  }
  func.func @transform_2(%arg0: i32, %arg1: memref<1xi32, #tpu.memory_space<smem>>) -> (i32, i32, i32) {
    %c0_i32 = arith.constant 0 : i32
    %c0_i32_0 = arith.constant 0 : i32
    %c0_i32_1 = arith.constant 0 : i32
    return %arg0, %c0_i32, %c0_i32_0 : i32, i32, i32
  }
}

</mosaic_0001>

<bundles_post_ra>
// kernel: tpu_custom_call.1
= control target key start
LH: loop header
LB: loop body
LE: loop exit
PB: predicated region body
PF: predicated region fallthrough
CT: control target
= control target key end

     0   :  { %9 = vsyncpa [#allocation5], 0  ;;  %s275_s0 = inlined_call_operand.<no memory space> [shape: s32[1], index: 0, kind: input, shape index: {}]   ;;  %s276_s1 = inlined_call_operand.hbm [shape: f32[8,2,32], index: 1, kind: input, shape index: {}]   ;;  %s277_s2 = inlined_call_operand.hbm [shape: f32[8,1,32], index: 2, kind: input, shape index: {}]   ;;  %s278_s3 = inlined_call_operand.hbm [shape: f32[8,2,32], index: 3, kind: output, shape index: {}]  }
   0x1   :  { %10 = vsyncpa [#allocation8], 0 }
   0x2   :  { %11 = vsyncpa [#allocation6], 0  ;;  %s222_s12 = smov [#allocation4]  }
   0x3   :  { %s17_s13 = sshll.u32 %s222_s12, 4  ;;  %s18_s13 = int_to_ptr.vmem [resolvable:$true] %s17_s13 }
   0x4   :  { %s164_s14 = scalar_lea.vmem %s18_s13, 256  ;;  %p169_p1 = scmp.lt.s32.totalorder %s18_s13, %s18_s13 }
   0x5   :  { %p165_p0 = scmp.ne.s32.totalorder %s18_s13, %s164_s14  ;;  %p170_p2 = scmp.lt.s32.totalorder %s164_s14, %s164_s14 }
   0x7   :  { %p171_p3 = por %p170_p2, %p169_p1 }
   0x9   :  { %p172_p4 = pnand %p171_p3, %p165_p0 }
   0xb   :  { %175 = shalt.err (!%p172_p4)
}
   0xc   :  { %s223_s0 = smov 32   ;;  %s224_s15 = smov 2  }
   0xd   :  { %23 = dma.hbm_to_vmem [thread:$0]  %s276_s1, 256, %s18_s13, [#allocation5], %s223_s0, %s223_s0, %s224_s15  }
   0xe   :  { %s225_s18 = smov [#allocation7]  }
   0xf   :  { %s29_s19 = sshll.u32 %s225_s18, 4  ;;  %s30_s19 = int_to_ptr.vmem [resolvable:$true] %s29_s19 }
  0x10   :  { %s184_s20 = scalar_lea.vmem %s30_s19, 128  ;;  %p189_p6 = scmp.lt.s32.totalorder %s30_s19, %s30_s19 }
  0x11   :  { %p185_p5 = scmp.ne.s32.totalorder %s30_s19, %s184_s20  ;;  %p190_p7 = scmp.lt.s32.totalorder %s184_s20, %s184_s20 }
  0x13   :  { %p191_p8 = por %p190_p7, %p189_p6 }
  0x15   :  { %p192_p9 = pnand %p191_p8, %p185_p5 }
  0x17   :  { %195 = shalt.err (!%p192_p9)
}
  0x18   :  { %s226_s21 = smov 16   ;;  %s227_s22 = smov 1  }
  0x19   :  { %35 = dma.hbm_to_vmem [thread:$0]  %s277_s2, 128, %s30_s19, [#allocation8], %s226_s21, %s226_s21, %s227_s22  }
  0x1a   :  { %216 = dma.done.wait [#allocation5], 256  }
  0x1b   :  { %217 = vsyncadd [#allocation5], 4294967040 }
  0x1c   :  { %218 = dma.done.wait [#allocation8], 128  }
  0x1d   :  { %219 = vsyncadd [#allocation8], 4294967168  ;;  %vm114_vm0 = vcmask 254976   ;;  %s228_s1 = smov [#allocation9]   ;;  %v42_v0 = vld [vmem:[#allocation4] sm:$0x3] }
  0x1e   :  { %s258_s25 = sshll.u32 %s228_s1, 4  ;;  %v141_v1 = vld [vmem:[#allocation7] ss:$0 sm:$0xff]  ;;  %v43_v2 = vld [vmem:[#allocation4 + $0x2] sm:$0x3]  ;;  %s129_s25 = int_to_ptr.vmem [resolvable:$true] %s258_s25 }
  0x1f   :  { %v106_v3 = vadd.f32 %v141_v1, %v42_v0  ;;  %v142_v4 = vld [vmem:[#allocation7 + $0x1] ss:$0 sm:$0xff]  ;;  %v44_v5 = vld [vmem:[#allocation4 + $0x4] sm:$0x3]  ;;  %v143_v6 = vld [vmem:[#allocation7 + $0x2] ss:$0 sm:$0xff]  ;;  %p201_p11 = scmp.lt.s32.totalorder %s129_s25, %s129_s25 }
  0x20   :  { %v107_v7 = vadd.f32 %v142_v4, %v43_v2  ;;  %v108_v8 = vadd.f32 %v143_v6, %v44_v5  ;;  %v45_v9 = vld [vmem:[#allocation4 + $0x6] sm:$0x3]  ;;  %v144_v10 = vld [vmem:[#allocation7 + $0x3] ss:$0 sm:$0xff]  ;;  %v46_v11 = vld [vmem:[#allocation4 + $0x8] sm:$0x3] }
  0x21   :  { %115 = vst.msk [vmem:[#allocation9] sm:$0x3] %vm114_vm0, %v106_v3  ;;  %v109_v12 = vadd.f32 %v144_v10, %v45_v9  ;;  %v145_v13 = vld [vmem:[#allocation7 + $0x4] ss:$0 sm:$0xff]  ;;  %v47_v14 = vld [vmem:[#allocation4 + $0xa] sm:$0x3] }
  0x22   :  { %v146_v15 = vld [vmem:[#allocation7 + $0x5] ss:$0 sm:$0xff]  ;;  %116 = vst.msk [vmem:[#allocation9 + $0x2] sm:$0x3] %vm114_vm0, %v107_v7  ;;  %117 = vst.msk [vmem:[#allocation9 + $0x4] sm:$0x3] %vm114_vm0, %v108_v8  ;;  %v110_v16 = vadd.f32 %v145_v13, %v46_v11 }
  0x23   :  { %v111_v17 = vadd.f32 %v146_v15, %v47_v14  ;;  %v48_v18 = vld [vmem:[#allocation4 + $0xc] sm:$0x3]  ;;  %v147_v19 = vld [vmem:[#allocation7 + $0x6] ss:$0 sm:$0xff]  ;;  %v49_v20 = vld [vmem:[#allocation4 + $0xe] sm:$0x3] }
  0x24   :  { %118 = vst.msk [vmem:[#allocation9 + $0x6] sm:$0x3] %vm114_vm0, %v109_v12  ;;  %v112_v21 = vadd.f32 %v147_v19, %v48_v18  ;;  %v148_v22 = vld [vmem:[#allocation7 + $0x7] ss:$0 sm:$0xff]  ;;  %119 = vst.msk [vmem:[#allocation9 + $0x8] sm:$0x3] %vm114_vm0, %v110_v16 }
  0x25   :  { %120 = vst.msk [vmem:[#allocation9 + $0xa] sm:$0x3] %vm114_vm0, %v111_v17  ;;  %v113_v23 = vadd.f32 %v148_v22, %v49_v20  ;;  %s196_s2 = scalar_lea.vmem %s129_s25, 256 }
  0x26   :  { %121 = vst.msk [vmem:[#allocation9 + $0xc] sm:$0x3] %vm114_vm0, %v112_v21  ;;  %p197_p10 = scmp.ne.s32.totalorder %s129_s25, %s196_s2  ;;  %p202_p12 = scmp.lt.s32.totalorder %s196_s2, %s196_s2 }
  0x27   :  { %122 = vst.msk [vmem:[#allocation9 + $0xe] sm:$0x3] %vm114_vm0, %v113_v23 }
  0x28   :  { %p203_p13 = por %p202_p12, %p201_p11 }
  0x2a   :  { %p204_p0 = pnand %p203_p13, %p197_p10 }
  0x2c   :  { %207 = shalt.err (!%p204_p0)
}
  0x2d   :  { %134 = dma.vmem_to_hbm [thread:$0]  %s129_s25, 256, %s278_s3, [#allocation6], %s223_s0, %s223_s0, %s224_s15  }
  0x2e   :  { %220 = dma.done.wait [#allocation6], 256  }
  0x2f   :  { %221 = vsyncadd [#allocation6], 4294967040 }
  0x30   :  { %138 = vsyncpa [#allocation5], 1 }
  0x31   :  { %139 = vsyncpa [#allocation8], 1 }
  0x32   :  { %140 = vsyncpa [#allocation6], 1 }

</bundles_post_ra>
